<compile_context>
chip_gen: v7x
topology: tpu7x:2x2x1
jax: 0.10.0
libtpu: 0.0.40
codegen_flags: <defaults>
</compile_context>

<pallas_src>
import functools

import jax
import jax.numpy as jnp
from jax import lax
from jax.experimental import pallas as pl
from jax.experimental.pallas import tpu as pltpu


def _head_kernel(x_ref, w_ref, o_ref, *, scale):
    # x_ref: (BB, T, C) bf16 block; w_ref: (C, 3*HP) bf16 fused [q | k | v]
    # o_ref: (BB, T, HP) output block (HP = head size padded to 128 lanes)
    bb, t, c = x_ref.shape
    hp = w_ref.shape[-1] // 3

    x = x_ref[...]                       # bf16
    w = w_ref[...]                       # bf16

    # Fused projection: one wide MXU matmul, f32 accumulation.
    qkv = jnp.dot(x.reshape(bb * t, c), w,
                  preferred_element_type=jnp.float32).reshape(bb, t, 3 * hp)

    # Slice at 128-lane boundaries (tile aligned); scale q up front (T*H muls
    # instead of T*T), then drop operands back to bf16 for the MXU.
    q = (qkv[:, :, 0 * hp:1 * hp] * scale).astype(jnp.bfloat16)
    k = qkv[:, :, 1 * hp:2 * hp].astype(jnp.bfloat16)
    v = qkv[:, :, 2 * hp:3 * hp].astype(jnp.bfloat16)

    # Attention scores: contract the head dim directly (no transpose copy).
    wei = jnp.einsum("bqh,bkh->bqk", q, k,
                     preferred_element_type=jnp.float32)        # (BB, T, T) f32

    # Causal mask == masked_fill(tril == 0, -inf); diagonal is always valid.
    row = lax.broadcasted_iota(jnp.int32, wei.shape, 1)
    col = lax.broadcasted_iota(jnp.int32, wei.shape, 2)
    wei = jnp.where(col <= row, wei, -jnp.inf)

    # Numerically stable softmax in f32; reciprocal on the EUP slot.
    m = jnp.max(wei, axis=-1, keepdims=True)
    e = jnp.exp(wei - m)
    inv = pl.reciprocal(jnp.sum(e, axis=-1, keepdims=True), approx=True)
    p = (e * inv).astype(jnp.bfloat16)

    # TODO(synk): nn.Dropout on attention weights omitted (inference / p = 0).

    out = jnp.einsum("bqk,bkh->bqh", p, v,
                     preferred_element_type=jnp.float32)        # (BB, T, HP)
    o_ref[...] = out.astype(o_ref.dtype)                        # lane-dense store


def head_forward(x, w_key, w_query, w_value, *, batch_block=None):
    """x: (B, T, C); w_*: (H, C) torch-style Linear weights (bias-free)."""
    B, T, C = x.shape
    H = w_key.shape[0]
    HP = pl.cdiv(H, 128) * 128                  # head dim padded to full lanes
    scale = float(C) ** -0.5                    # matches the module: C, not H

    if batch_block is None:
        batch_block = min(B, 8)
    while B % batch_block:                      # pick a divisor of B
        batch_block -= 1

    # Host-side weight prep: transpose to (C, H), cast bf16, zero-pad H -> HP,
    # concatenate as [q | k | v] so each slab starts on a 128-lane boundary.
    def _prep(w):
        return jnp.pad(w.T.astype(jnp.bfloat16), ((0, 0), (0, HP - H)))

    w_fused = jnp.concatenate([_prep(w_query), _prep(w_key), _prep(w_value)],
                              axis=-1)          # (C, 3*HP) bf16
    x_bf16 = x.astype(jnp.bfloat16)

    kernel = functools.partial(_head_kernel, scale=scale)

    cost = pl.CostEstimate(
        flops=2 * B * T * (C * 3 * HP + T * HP + T * HP),
        transcendentals=B * T * (T + 1),        # exp + reciprocal
        bytes_accessed=int(x_bf16.size * 2 + w_fused.size * 2
                           + B * T * HP * x.dtype.itemsize),
    )

    out_padded = pl.pallas_call(
        kernel,
        out_shape=jax.ShapeDtypeStruct((B, T, HP), x.dtype),
        grid_spec=pltpu.PrefetchScalarGridSpec(
            num_scalar_prefetch=0,
            grid=(B // batch_block,),
            in_specs=[
                pl.BlockSpec((batch_block, T, C), lambda b: (b, 0, 0)),  # x block
                pl.BlockSpec((C, 3 * HP), lambda b: (0, 0)),             # fused W
            ],
            out_specs=pl.BlockSpec((batch_block, T, HP), lambda b: (b, 0, 0)),
        ),
        compiler_params=pltpu.CompilerParams(
            dimension_semantics=("parallel",),
        ),
        cost_estimate=cost,
    )(x_bf16, w_fused)

    return out_padded[:, :, :H]                 # drop the lane padding


def head_reference(x, w_key, w_query, w_value):
    """Pure-JAX f32 reference mirroring the PyTorch forward (dropout = identity)."""
    B, T, C = x.shape
    k = x @ w_key.T
    q = x @ w_query.T
    v = x @ w_value.T
    wei = (q @ jnp.swapaxes(k, -2, -1)) * (float(C) ** -0.5)
    mask = jnp.tril(jnp.ones((T, T), dtype=bool))
    wei = jnp.where(mask, wei, -jnp.inf)
    wei = jax.nn.softmax(wei, axis=-1)
    return wei @ v


if __name__ == "__main__":
    # Shapes consistent with Head(head_size, num_embds, block_size, dropout)
    B, T = 2, 8           # batch, sequence length (== block_size)
    C = 32                # num_embds
    H = 16                # head_size

    key = jax.random.PRNGKey(0)
    kx, kk, kq, kv = jax.random.split(key, 4)

    x = jax.random.normal(kx, (B, T, C), dtype=jnp.float32)
    # deterministic synthetic Linear weights, torch layout (out_features, in_features)
    w_key = jax.random.normal(kk, (H, C), dtype=jnp.float32) * (C ** -0.5)
    w_query = jax.random.normal(kq, (H, C), dtype=jnp.float32) * (C ** -0.5)
    w_value = jax.random.normal(kv, (H, C), dtype=jnp.float32) * (C ** -0.5)

    out = head_forward(x, w_key, w_query, w_value)
    out = jax.block_until_ready(out)

    ref = head_reference(x, w_key, w_query, w_value)
    assert out.shape == (B, T, H)
    # bf16 matmul operands (f32 accumulation) + approx reciprocal -> bf16-level tolerance
    assert jnp.allclose(out, ref, atol=3e-2, rtol=3e-2), "mismatch vs reference"

    print("KERNEL_OK")
</pallas_src>

<mosaic_0001>
module attributes {stable_mosaic.version = 11 : i64} {
  func.func @_head_kernel(%arg0: i32, %arg1: memref<2x8x32xbf16, #tpu.memory_space<vmem>>, %arg2: memref<32x384xbf16, #tpu.memory_space<vmem>>, %arg3: memref<2x8x128xf32, #tpu.memory_space<vmem>>) attributes {dimension_semantics = [#tpu.dimension_semantics<parallel>], iteration_bounds = array<i64: 1>, scalar_prefetch = 0 : i64, scratch_operands = 0 : i64, tpu.core_type = #tpu.core_type<tc>, window_params = [{transform_indices = @transform_0, window_bounds = array<i64: 2, 8, 32>}, {pipeline_mode = #tpu.pipeline_mode<synchronous>, transform_indices = @transform_1, window_bounds = array<i64: 32, 384>}, {transform_indices = @transform_2, window_bounds = array<i64: 2, 8, 128>}]} {
    %c0 = arith.constant 0 : index
    %c0_0 = arith.constant 0 : index
    %c0_1 = arith.constant 0 : index
    %0 = vector.load %arg1[%c0, %c0_0, %c0_1] : memref<2x8x32xbf16, #tpu.memory_space<vmem>>, vector<2x8x32xbf16>
    %c0_2 = arith.constant 0 : index
    %c0_3 = arith.constant 0 : index
    %1 = vector.load %arg2[%c0_2, %c0_3] : memref<32x384xbf16, #tpu.memory_space<vmem>>, vector<32x384xbf16>
    %2 = vector.shape_cast %0 : vector<2x8x32xbf16> to vector<16x32xbf16>
    %cst = arith.constant dense<0.000000e+00> : vector<16x384xf32>
    %3 = tpu.matmul %2, %1, %cst {dimension_numbers = #tpu.dot_dimension_numbers<[1], [0], [0], [1], [0, 0, 1, 1], [], []>} : vector<16x32xbf16>, vector<32x384xbf16>, vector<16x384xf32> -> vector<16x384xf32>
    %4 = vector.shape_cast %3 : vector<16x384xf32> to vector<2x8x384xf32>
    %5 = vector.extract_strided_slice %4 {offsets = [0, 0, 0], sizes = [2, 8, 128], strides = [1, 1, 1]} : vector<2x8x384xf32> to vector<2x8x128xf32>
    %cst_4 = arith.constant 0.176776692 : f32
    %6 = vector.broadcast %cst_4 : f32 to vector<2x8x128xf32>
    %7 = arith.mulf %5, %6 : vector<2x8x128xf32>
    %8 = arith.truncf %7 : vector<2x8x128xf32> to vector<2x8x128xbf16>
    %9 = vector.extract_strided_slice %4 {offsets = [0, 0, 128], sizes = [2, 8, 128], strides = [1, 1, 1]} : vector<2x8x384xf32> to vector<2x8x128xf32>
    %10 = arith.truncf %9 : vector<2x8x128xf32> to vector<2x8x128xbf16>
    %11 = vector.extract_strided_slice %4 {offsets = [0, 0, 256], sizes = [2, 8, 128], strides = [1, 1, 1]} : vector<2x8x384xf32> to vector<2x8x128xf32>
    %12 = arith.truncf %11 : vector<2x8x128xf32> to vector<2x8x128xbf16>
    "tpu.trace_start"() <{level = 10 : i32, message = "bqh,bkh->bqk"}> : () -> ()
    %cst_5 = arith.constant dense<0.000000e+00> : vector<2x8x8xf32>
    %13 = tpu.matmul %8, %10, %cst_5 {dimension_numbers = #tpu.dot_dimension_numbers<[2], [2], [1], [1], [0, 0, 0, 1, 1, 1], [0], [0]>} : vector<2x8x128xbf16>, vector<2x8x128xbf16>, vector<2x8x8xf32> -> vector<2x8x8xf32>
    "tpu.trace_stop"() : () -> ()
    %14 = tpu.iota {dimensions = array<i32: 1>} : vector<2x8x8xi32>
    %15 = tpu.iota {dimensions = array<i32: 2>} : vector<2x8x8xi32>
    %16 = arith.cmpi sle, %15, %14 : vector<2x8x8xi32>
    %cst_6 = arith.constant 0xFF800000 : f32
    %17 = vector.broadcast %cst_6 : f32 to vector<2x8x8xf32>
    %18 = arith.select %16, %13, %17 : vector<2x8x8xi1>, vector<2x8x8xf32>
    %cst_7 = arith.constant dense<0xFF800000> : vector<2x8xf32>
    %19 = vector.multi_reduction <maximumf>, %18, %cst_7 [2] : vector<2x8x8xf32> to vector<2x8xf32>
    %20 = vector.shape_cast %19 : vector<2x8xf32> to vector<2x8x1xf32>
    %21 = vector.broadcast %20 : vector<2x8x1xf32> to vector<2x8x8xf32>
    %22 = arith.subf %18, %21 : vector<2x8x8xf32>
    %23 = math.exp %22 : vector<2x8x8xf32>
    %cst_8 = arith.constant dense<0.000000e+00> : vector<2x8xf32>
    %24 = vector.multi_reduction <add>, %23, %cst_8 [2] : vector<2x8x8xf32> to vector<2x8xf32>
    %25 = vector.shape_cast %24 : vector<2x8xf32> to vector<2x8x1xf32>
    %26 = tpu.reciprocal %25 {approx = true} : vector<2x8x1xf32> -> vector<2x8x1xf32>
    %27 = vector.broadcast %26 : vector<2x8x1xf32> to vector<2x8x8xf32>
    %28 = arith.mulf %23, %27 : vector<2x8x8xf32>
    %29 = arith.truncf %28 : vector<2x8x8xf32> to vector<2x8x8xbf16>
    "tpu.trace_start"() <{level = 10 : i32, message = "bqk,bkh->bqh"}> : () -> ()
    %cst_9 = arith.constant dense<0.000000e+00> : vector<2x8x128xf32>
    %30 = tpu.matmul %29, %12, %cst_9 {dimension_numbers = #tpu.dot_dimension_numbers<[2], [1], [1], [2], [0, 0, 0, 1, 1, 2], [0], [0]>} : vector<2x8x8xbf16>, vector<2x8x128xbf16>, vector<2x8x128xf32> -> vector<2x8x128xf32>
    "tpu.trace_stop"() : () -> ()
    %c0_10 = arith.constant 0 : index
    %c0_11 = arith.constant 0 : index
    %c0_12 = arith.constant 0 : index
    %31 = vector.load %arg3[%c0_10, %c0_11, %c0_12] : memref<2x8x128xf32, #tpu.memory_space<vmem>>, vector<2x8x128xf32>
    tpu.vector_store %arg3[%c0_10, %c0_11, %c0_12], %30 {strides = array<i32>} : memref<2x8x128xf32, #tpu.memory_space<vmem>>, vector<2x8x128xf32>,
    return
  }
  func.func @transform_0(%arg0: i32) -> (i32, i32, i32) {
    %c0_i32 = arith.constant 0 : i32
    %c0_i32_0 = arith.constant 0 : i32
    %c0_i32_1 = arith.constant 0 : i32
    return %arg0, %c0_i32, %c0_i32_0 : i32, i32, i32
  }
  func.func @transform_1(%arg0: i32) -> (i32, i32) {
    %c0_i32 = arith.constant 0 : i32
    %c0_i32_0 = arith.constant 0 : i32
    %c0_i32_1 = arith.constant 0 : i32
    return %c0_i32, %c0_i32_0 : i32, i32
  }
  func.func @transform_2(%arg0: i32) -> (i32, i32, i32) {
    %c0_i32 = arith.constant 0 : i32
    %c0_i32_0 = arith.constant 0 : i32
    %c0_i32_1 = arith.constant 0 : i32
    return %arg0, %c0_i32, %c0_i32_0 : i32, i32, i32
  }
}

</mosaic_0001>

<bundles_post_ra>
// kernel: tpu_custom_call.1
= control target key start
LH: loop header
LB: loop body
LE: loop exit
PB: predicated region body
PF: predicated region fallthrough
CT: control target
= control target key end

     0   :  { %7 = vsyncpa [#allocation3], 0  ;;  %s638_s0 = inlined_call_operand.hbm [shape: bf16[2,8,32], index: 0, kind: input, shape index: {}]   ;;  %s639_s1 = inlined_call_operand.hbm [shape: bf16[32,384], index: 1, kind: input, shape index: {}]   ;;  %s640_s2 = inlined_call_operand.hbm [shape: f32[2,8,128], index: 2, kind: output, shape index: {}]  }
   0x1   :  { %8 = vsyncpa [#allocation6], 0 }
   0x2   :  { %9 = vsyncpa [#allocation4], 0  ;;  %s564_s9 = smov [#allocation2]   ;;  %s492_s13 = scalar_lea.hbm %s638_s0, 128 }
   0x3   :  { %s15_s10 = sshll.u32 %s564_s9, 4  ;;  %p493_p0 = scmp.ne.s32.totalorder %s638_s0, %s492_s13  ;;  %s16_s10 = int_to_ptr.vmem [resolvable:$true] %s15_s10 }
   0x4   :  { %p496_p1 = scmp.lt.u32.totalorder %s492_s13, %s638_s0 }
   0x6   :  { %p498_p2 = pnand %p496_p1, %p493_p0 }
   0x8   :  { %501 = shalt.err (!%p498_p2)
}
   0x9   :  { %s502_s18 = scalar_lea.vmem %s16_s10, 128  ;;  %p507_p4 = scmp.lt.s32.totalorder %s16_s10, %s16_s10 }
   0xa   :  { %p503_p3 = scmp.ne.s32.totalorder %s16_s10, %s502_s18  ;;  %p508_p5 = scmp.lt.s32.totalorder %s502_s18, %s502_s18 }
   0xc   :  { %p509_p6 = por %p508_p5, %p507_p4 }
   0xe   :  { %p510_p7 = pnand %p509_p6, %p503_p3 }
  0x10   :  { %513 = shalt.err (!%p510_p7)
}
  0x11   :  { %s565_s19 = smov 64   ;;  %s566_s20 = smov 4  }
  0x12   :  { %21 = dma.hbm_to_vmem [thread:$0]  %s638_s0, 128, %s16_s10, [#allocation3], %s565_s19, %s565_s19, %s566_s20  }
  0x13   :  { %s567_s23 = smov [#allocation5]   ;;  %s514_s27 = scalar_lea.hbm %s639_s1, 768 }
  0x14   :  { %s27_s24 = sshll.u32 %s567_s23, 4  ;;  %p515_p8 = scmp.ne.s32.totalorder %s639_s1, %s514_s27  ;;  %s28_s24 = int_to_ptr.vmem [resolvable:$true] %s27_s24 }
  0x15   :  { %p518_p9 = scmp.lt.u32.totalorder %s514_s27, %s639_s1 }
  0x17   :  { %p520_p10 = pnand %p518_p9, %p515_p8 }
  0x19   :  { %523 = shalt.err (!%p520_p10)
}
  0x1a   :  { %s524_s4 = scalar_lea.vmem %s28_s24, 768  ;;  %p529_p12 = scmp.lt.s32.totalorder %s28_s24, %s28_s24 }
  0x1b   :  { %p525_p11 = scmp.ne.s32.totalorder %s28_s24, %s524_s4  ;;  %p530_p13 = scmp.lt.s32.totalorder %s524_s4, %s524_s4 }
  0x1d   :  { %p531_p0 = por %p530_p13, %p529_p12 }
  0x1f   :  { %p532_p1 = pnand %p531_p0, %p525_p11 }
  0x21   :  { %535 = shalt.err (!%p532_p1)
}
  0x22   :  { %s568_s0 = smov 192   ;;  %s569_s5 = smov 12  }
  0x23   :  { %33 = dma.hbm_to_vmem [thread:$0]  %s639_s1, 768, %s28_s24, [#allocation6], %s568_s0, %s568_s0, %s569_s5  }
  0x24   :  { %558 = dma.done.wait [#allocation3], 128  }
  0x25   :  { %559 = vsyncadd [#allocation3], 4294967168 }
  0x26   :  { %560 = dma.done.wait [#allocation6], 768  }
  0x27   :  { %561 = vsyncadd [#allocation6], 4294966528  ;;  %v570_v0 = vmov 0   ;;  %v571_v1 = vmov 0.0   ;;  %v475_v2 = vld [vmem:[#allocation5 + $0x4] ss:$12 sps:$4 sm:$0xff]   ;;  %v264_v27 = vlaneseq }
  0x28   :  { %124 = vmatprep.mubr.bf16.mxu0 %v570_v0  ;;  %431 = vmatprep.subr.bf16.mxu1 %v571_v1  ;;  %v477_v3 = vld [vmem:[#allocation5] ss:$12 sps:$4 sm:$0xff]   ;;  %v478_v4 = vld [vmem:[#allocation5 + $0x1c] ss:$12 sps:$4 sm:$0xff]   ;;  %v480_v5 = vld [vmem:[#allocation5 + $0x18] ss:$12 sps:$4 sm:$0xff]  }
  0x29   :  { %92 = vmatprep.subr.bf16.mxu0 %v475_v2  ;;  %v482_v6 = vld [vmem:[#allocation5 + $0x8] ss:$12 sps:$4 sm:$0xff]   ;;  %v481_v7 = vld [vmem:[#allocation2] sm:$0xff]   ;;  %v483_v8 = vld [vmem:[#allocation5 + $0x20] ss:$12 sps:$4 sm:$0xff]   ;;  %vm88_vm0 = vcmask 261120  }
  0x2a   :  { %93 = vmatpush1.bf16.msra.mxu0 %v477_v3  ;;  %432 = vmatpush3.bf16.msra.mxu1 %v482_v6  ;;  %vm572_vm1 = vmmov 0   ;;  %vm299_vm2 = vcmask 1043456   ;;  %v265_v28 = vshrl.u32 %v264_v27, 7  ;;  %v267_v29 = vand.u32 127, %v264_v27  ;;  %s573_s1 = smov [#allocation7]  }
  0x2b   :  { %94 = vmatprep.subr.bf16.mxu0 %v478_v4  ;;  %433 = vmatprep.subr.bf16.mxu1 %v571_v1  ;;  %vm271_vm4 = vcmask 64512   ;;  %s396_s8 = sshll.u32 %s573_s1, 4  ;;  %s397_s8 = int_to_ptr.vmem [resolvable:$true] %s396_s8 }
  0x2c   :  { %435 = vmatprep.mubr.msk.bf16.mxu1 %vm572_vm1, %v571_v1  ;;  %vm268_vm3 = vcmp.le.s32.totalorder %v267_v29, %v265_v28  ;;  %s536_s9 = scalar_lea.vmem %s397_s8, 256  ;;  %p541_p3 = scmp.lt.s32.totalorder %s397_s8, %s397_s8 }
  0x2d   :  { %p537_p2 = scmp.ne.s32.totalorder %s397_s8, %s536_s9  ;;  %p542_p4 = scmp.lt.s32.totalorder %s536_s9, %s536_s9 }
  0x2e   :  { %95 = vmatpush1.bf16.msra.mxu0 %v480_v5  ;;  %434 = vmatpush3.bf16.msra.mxu1 %v483_v8 }
  0x2f   :  { %439 = vmatprep.subr.bf16.mxu0 %v571_v1  ;;  %445 = vmatprep.subr.bf16.mxu1 %v571_v1  ;;  %p543_p5 = por %p542_p4, %p541_p3 }
  0x31   :  { %416 = vmatmul.mubr.msk.bf16.vlgmr.msra.gmra.mrb[0].mxu0 %vm88_vm0, %v481_v7  ;;  %436 = vmatmul.mubr.msk.bf16.vlgmr.msra.gmra.mrb[0].mxu1 %vm88_vm0, %v481_v7  ;;  %p544_p6 = pnand %p543_p5, %p537_p2 }
  0x32   :  { %441 = vmatprep.mubr.msk.bf16.mxu0 %vm572_vm1, %v571_v1  ;;  %447 = vmatprep.mubr.msk.bf16.mxu1 %vm572_vm1, %v571_v1 }
 0x104   :  { %v126_v9 = vpop.f32.mrb[0].mxu0  ;;  %v169_v19 = vpop.f32.mrb[0].mxu1 }
 0x105   :  { %v128_v10 = vpop.f32.mrb[1].mxu0  ;;  %v176_v15 = vmul.f32 0.17677669, %v126_v9  ;;  %v182_v20 = vpack.c.bf16 %v169_v19, %v169_v19  ;;  %v437_v21 = vpop.f32.mrb[1].mxu1 }
 0x106   :  { %v180_v11 = vpack.c.bf16 %v128_v10, %v128_v10  ;;  %v130_v12 = vpop.f32.mrb[2].mxu0  ;;  %v172_v22 = vpop.f32.mrb[2].mxu1 }
 0x107   :  { %v132_v13 = vpop.f32.mrb[3].mxu0  ;;  %v177_v16 = vmul.f32 0.17677669, %v130_v12  ;;  %v178_v17 = vpack.c.bf16 %v176_v15, %v176_v15  ;;  %v301_v23 = vsel %vm299_vm2, %v182_v20, 0  ;;  %v183_v24 = vpack.c.bf16 %v172_v22, %v172_v22  ;;  %v438_v25 = vpop.f32.mrb[3].mxu1 }
 0x108   :  { %v181_v14 = vpack.c.bf16 %v132_v13, %v132_v13  ;;  %440 = vmatpush3.bf16.xpose.msra.mxu0 %v180_v11 }
 0x109   :  { %451 = vmatprep.subr.bf16.mxu0 %v571_v1  ;;  %v179_v18 = vpack.c.bf16 %v177_v16, %v177_v16  ;;  %v347_v26 = vsel %vm299_vm2, %v183_v24, 0 }
 0x10a   :  { %446 = vmatpush3.bf16.xpose.msra.mxu1 %v181_v14 }
 0x10b   :  { %457 = vmatprep.subr.bf16.mxu1 %v571_v1 }
 0x10f   :  { %442 = vmatmul.mubr.bf16.vlgmr.msra.gmra.mrb[4].mxu0 %v178_v17 }
 0x110   :  { %453 = vmatprep.mubr.msk.bf16.mxu0 %vm572_vm1, %v571_v1  ;;  %452 = vmatpush3.bf16.msra.mxu0 %v301_v23 }
 0x111   :  { %448 = vmatmul.mubr.bf16.vlgmr.msra.gmra.mrb[4].mxu1 %v179_v18 }
 0x112   :  { %459 = vmatprep.mubr.msk.bf16.mxu1 %vm572_vm1, %v571_v1  ;;  %458 = vmatpush3.bf16.msra.mxu1 %v347_v26 }
 0x1e2   :  { %v218_v30 = vpop.f32.mrb[4].mxu0 }
 0x1e3   :  { %v269_v31 = vsel %vm268_vm3, %v218_v30, -inf  ;;  %v443_v32 = vpop.f32.mrb[5].mxu0 }
 0x1e4   :  { %v221_v33 = vpop.f32.mrb[6].mxu0  ;;  %v258_v34 = vpop.f32.mrb[4].mxu1  ;;  %v272_v35 = vsel %vm271_vm4, %v269_v31, -inf }
 0x1e5   :  { %v270_v36 = vsel %vm268_vm3, %v258_v34, -inf  ;;  %273 = vmax.xlane.f32.xlu0 %v272_v35  ;;  %v444_v37 = vpop.f32.mrb[7].mxu0  ;;  %v449_v38 = vpop.f32.mrb[5].mxu1 }
 0x1e6   :  { %v261_v39 = vpop.f32.mrb[6].mxu1  ;;  %v275_v41 = vsel %vm271_vm4, %v270_v36, -inf }
 0x1e7   :  { %v450_v40 = vpop.f32.mrb[7].mxu1 }
 0x1e9   :  { %276 = vmax.xlane.f32.xlu0 %v275_v41 }
 0x272   :  { %v274_v42 = vpop.xlane.xlu0 %273 }
 0x273   :  { %v278_v43 = vsub.f32 %v269_v31, %v274_v42 }
 0x275   :  { %v280_v44 = vmul.f32 1.442695, %v278_v43 }
 0x276   :  { %v277_v45 = vpop.xlane.xlu0 %276 }
 0x277   :  { %484 = vpow2.f32 %v280_v44  ;;  %v279_v46 = vsub.f32 %v270_v36, %v277_v45 }
 0x279   :  { %v282_v47 = vmul.f32 1.442695, %v279_v46 }
 0x27b   :  { %486 = vpow2.f32 %v282_v47 }
 0x281   :  { %v485_v48 = vpop.eup %484 }
 0x282   :  { %v284_v49 = vsel %vm271_vm4, %v485_v48, 0.0 }
 0x283   :  { %285 = vadd.xlane.f32.xlu1 %v284_v49 }
 0x285   :  { %v487_v50 = vpop.eup %486 }
 0x286   :  { %v287_v51 = vsel %vm271_vm4, %v487_v50, 0.0 }
 0x287   :  { %288 = vadd.xlane.f32.xlu1 %v287_v51 }
 0x310   :  { %v286_v52 = vpop.xlane.xlu1 %285 }
 0x311   :  { %488 = vrcp.f32 %v286_v52 }
 0x314   :  { %v289_v53 = vpop.xlane.xlu1 %288 }
 0x315   :  { %490 = vrcp.f32 %v289_v53 }
 0x31b   :  { %v489_v54 = vpop.eup %488 }
 0x31c   :  { %v292_v55 = vmul.f32 %v489_v54, %v485_v48 }
 0x31e   :  { %v294_v56 = vpack.c.bf16 %v292_v55, %v292_v55 }
 0x31f   :  { %v491_v57 = vpop.eup %490 }
 0x320   :  { %v293_v58 = vmul.f32 %v491_v57, %v487_v50  ;;  %454 = vmatmul.mubr.msk.bf16.vlgmr.msra.gmra.mrb[8].mxu0 %vm271_vm4, %v294_v56 }
 0x322   :  { %v295_v59 = vpack.c.bf16 %v293_v58, %v293_v58 }
 0x324   :  { %460 = vmatmul.mubr.msk.bf16.vlgmr.msra.gmra.mrb[8].mxu1 %vm271_vm4, %v295_v59 }
 0x3f3   :  { %v337_v60 = vpop.f32.mrb[8].mxu0 }
 0x3f4   :  { %389 = vst [vmem:[#allocation7] sm:$0xff] %v337_v60  ;;  %v455_v61 = vpop.f32.mrb[9].mxu0 }
 0x3f5   :  { %v340_v62 = vpop.f32.mrb[10].mxu0 }
 0x3f6   :  { %v456_v63 = vpop.f32.mrb[11].mxu0 }
 0x3f7   :  { %v383_v0 = vpop.f32.mrb[8].mxu1 }
 0x3f8   :  { %390 = vst [vmem:[#allocation7 + $0x8] sm:$0xff] %v383_v0  ;;  %v461_v1 = vpop.f32.mrb[9].mxu1 }
 0x3f9   :  { %v386_v2 = vpop.f32.mrb[10].mxu1 }
 0x3fa   :  { %547 = shalt.err (!%p544_p6)
}
 0x3fb   :  { %s548_s12 = scalar_lea.hbm %s640_s2, 256 }
 0x3fc   :  { %p549_p7 = scmp.ne.s32.totalorder %s640_s2, %s548_s12  ;;  %p552_p8 = scmp.lt.u32.totalorder %s548_s12, %s640_s2 }
 0x3fe   :  { %p554_p9 = pnand %p552_p8, %p549_p7 }
 0x400   :  { %557 = shalt.err (!%p554_p9)
}
 0x401   :  { %s574_s17 = smov 128   ;;  %s575_s18 = smov 8   ;;  %v462_v3 = vpop.f32.mrb[11].mxu1 }
 0x402   :  { %402 = dma.vmem_to_hbm [thread:$0]  %s397_s8, 256, %s640_s2, [#allocation4], %s574_s17, %s574_s17, %s575_s18  }
 0x403   :  { %562 = dma.done.wait [#allocation4], 256  }
 0x404   :  { %563 = vsyncadd [#allocation4], 4294967040 }
 0x405   :  { %406 = vsyncpa [#allocation3], 1 }
 0x406   :  { %407 = vsyncpa [#allocation6], 1 }
 0x407   :  { %408 = vsyncpa [#allocation4], 1 }

</bundles_post_ra>
